<compile_context>
chip_gen: v6e
topology: v6e:2x2x1
jax: 0.10.0
libtpu: 0.0.40
codegen_flags: <defaults>
</compile_context>

<pallas_src>
import numpy as np
import jax
import jax.numpy as jnp
from jax.experimental import pallas as pl
from jax.experimental.pallas import tpu as pltpu

_LANE = 128
_SUBLANE = {4: 8, 2: 16, 1: 32}            # f32 / bf16 / int8|fp8 packing
_DEFAULT_BLOCK_BYTES = 4 * 1024 * 1024     # ~4 MiB per block (dtype-independent)
_VMEM_LIMIT_BYTES = 32 * 1024 * 1024       # 4 buffers x 4 MiB = 16 MiB << limit


# ----------------------------- Pallas kernel -------------------------------

def _scale_kernel(scale_ref, x_ref, o_ref):
    # scale_ref: SMEM (1,) f32 scalar; x_ref/o_ref: VMEM tiles (1-D or 2-D).
    # Multiply in f32 so bf16/fp8 grads don't round the warm-start coeff.
    o_ref[...] = (x_ref[...].astype(jnp.float32) * scale_ref[0]).astype(o_ref.dtype)


def _cost_estimate(n_elems: int, itemsize: int) -> pl.CostEstimate:
    return pl.CostEstimate(
        flops=n_elems,
        transcendentals=0,
        bytes_accessed=2 * n_elems * itemsize + 4,
    )


def _compiler_params() -> pltpu.CompilerParams:
    # TODO(synk): on v7x, verify in the trace that the grid actually shards
    # across the 2 TensorCores; if not, switch this axis to CORE_PARALLEL.
    return pltpu.CompilerParams(
        dimension_semantics=("parallel",),
        vmem_limit_bytes=_VMEM_LIMIT_BYTES,
    )


def _scale_2d(x2d: jax.Array, scale32: jax.Array, block_bytes: int) -> jax.Array:
    """Lane-dense (rows, 128) streaming path for 128-aligned element counts."""
    rows, lanes = x2d.shape
    itemsize = jnp.dtype(x2d.dtype).itemsize
    sub = _SUBLANE.get(itemsize, 8)
    # Byte-budgeted tile: same HBM-traffic-per-step for f32/bf16/int8.
    tile_r = max(sub, (block_bytes // (lanes * itemsize)) // sub * sub)
    if rows <= tile_r:
        tile_r = rows                      # full extent is always a legal block
    grid = (pl.cdiv(rows, tile_r),)        # ragged last block is masked
    return pl.pallas_call(
        _scale_kernel,
        out_shape=jax.ShapeDtypeStruct((rows, lanes), x2d.dtype),
        grid=grid,
        in_specs=[
            pl.BlockSpec(memory_space=pltpu.MemorySpace.SMEM),   # f32 scale
            pl.BlockSpec((tile_r, lanes), lambda i: (i, 0)),     # tiled grad
        ],
        out_specs=pl.BlockSpec((tile_r, lanes), lambda i: (i, 0)),
        input_output_aliases={1: 0},       # donate the gradient buffer
        cost_estimate=_cost_estimate(rows * lanes, itemsize),
        compiler_params=_compiler_params(),
    )(scale32, x2d)


def _scale_1d(flat: jax.Array, scale32: jax.Array, block_bytes: int) -> jax.Array:
    """Single-kernel path for lane-unaligned element counts.

    One pallas_call over the flat array; the ragged last block is padded on
    read and masked on write by Pallas (elementwise op), so there are no extra
    slice / pad / concatenate HBM passes and donation is preserved.
    """
    (n,) = flat.shape
    itemsize = jnp.dtype(flat.dtype).itemsize
    # Block elements: byte budget rounded down to a (8 x 128)-friendly multiple.
    tile_n = max(8 * _LANE, (block_bytes // itemsize) // (8 * _LANE) * (8 * _LANE))
    if n <= tile_n:
        tile_n = n                         # full extent is always legal
    grid = (pl.cdiv(n, tile_n),)
    return pl.pallas_call(
        _scale_kernel,
        out_shape=jax.ShapeDtypeStruct((n,), flat.dtype),
        grid=grid,
        in_specs=[
            pl.BlockSpec(memory_space=pltpu.MemorySpace.SMEM),
            pl.BlockSpec((tile_n,), lambda i: (i,)),
        ],
        out_specs=pl.BlockSpec((tile_n,), lambda i: (i,)),
        input_output_aliases={1: 0},
        cost_estimate=_cost_estimate(n, itemsize),
        compiler_params=_compiler_params(),
    )(scale32, flat)


def _pallas_scale(x: jax.Array, scale,
                  block_bytes: int = _DEFAULT_BLOCK_BYTES) -> jax.Array:
    """Elementwise x * scale through a tiled, pipelined Pallas kernel."""
    orig_shape = x.shape
    n = x.size
    if n == 0:
        return x
    scale32 = jnp.asarray(scale, jnp.float32).reshape(1)
    if n % _LANE == 0:
        rows = n // _LANE
        y = _scale_2d(x.reshape(rows, _LANE), scale32, block_bytes)
    else:
        y = _scale_1d(x.reshape(-1), scale32, block_bytes)
    return y.reshape(orig_shape)


# ----------------------- Gradient-reverse function -------------------------

@jax.custom_vjp
def gradient_reverse(x: jax.Array, coeff) -> jax.Array:
    # forward: identity (input * 1.0) -- no kernel, no HBM traffic.
    return x


def _grl_fwd(x, coeff):
    return x, jnp.asarray(coeff, jnp.float32)


def _grl_bwd(coeff, g):
    # backward: grad_output.neg() * coeff.  coeff is treated as
    # non-differentiable (zero cotangent), matching the PyTorch layer where it
    # is a plain Python float.
    return _pallas_scale(g, -coeff), jnp.zeros_like(coeff)


gradient_reverse.defvjp(_grl_fwd, _grl_bwd)


# --------------------- WarmStartGradientReverseLayer -----------------------

class WarmStartGradientReverseLayer:
    """JAX/Pallas port of the PyTorch WarmStartGradientReverseLayer."""

    def __init__(self, alpha=1.0, lo=0.0, hi=1.0, max_iters=1000.0,
                 auto_step=False):
        self.alpha = alpha
        self.lo = lo
        self.hi = hi
        self.iter_num = 0
        self.max_iters = max_iters
        self.auto_step = auto_step

    def _coeff(self) -> float:
        return float(np.float64(
            2.0 * (self.hi - self.lo)
            / (1.0 + np.exp(-self.alpha * self.iter_num / self.max_iters))
            - (self.hi - self.lo) + self.lo
        ))

    def __call__(self, x: jax.Array) -> jax.Array:
        coeff = self._coeff()
        if self.auto_step:
            self.step()
        # coeff passed as a traced f32 scalar (jit-friendly; the warm-start
        # schedule advancing never triggers a recompile).
        return gradient_reverse(x, jnp.float32(coeff))

    def step(self):
        self.iter_num += 1


# --------------------------------- main -------------------------------------

if __name__ == "__main__":
    key = jax.random.PRNGKey(0)
    x = jax.random.normal(key, (2, 4, 16, 16), dtype=jnp.float32)  # NCHW

    layer = WarmStartGradientReverseLayer(
        alpha=1.0, lo=0.0, hi=1.0, max_iters=1000, auto_step=True
    )

    # Forward pass (exact identity in value).
    y = jax.block_until_ready(layer(x))
    assert y.shape == x.shape and y.dtype == x.dtype
    np.testing.assert_allclose(np.asarray(y), np.asarray(x), rtol=0, atol=0)

    # Gradient reversal through the layer (iter_num is now 1).
    coeff1 = layer._coeff()
    loss_fn = lambda inp: jnp.sum(layer(inp))
    g = jax.block_until_ready(jax.grad(loss_fn)(x))
    np.testing.assert_allclose(
        np.asarray(g), -coeff1 * np.ones_like(np.asarray(x)),
        rtol=1e-6, atol=1e-6,
    )

    # Traced-coeff path under jit: one executable reused across coeff values.
    @jax.jit
    def grad_fn(inp, coeff):
        return jax.grad(lambda t: jnp.sum(gradient_reverse(t, coeff)))(inp)

    for c in (0.25, 0.75):
        gj = jax.block_until_ready(grad_fn(x, jnp.float32(c)))
        np.testing.assert_allclose(
            np.asarray(gj), -c * np.ones_like(np.asarray(x)),
            rtol=1e-6, atol=1e-6,
        )

    # Lane-unaligned element count exercises the single-kernel 1-D masked path.
    x_odd = jax.random.normal(jax.random.PRNGKey(1), (5, 129), dtype=jnp.float32)
    g_odd = jax.block_until_ready(
        jax.grad(lambda t: jnp.sum(gradient_reverse(t, jnp.float32(0.5))))(x_odd))
    np.testing.assert_allclose(
        np.asarray(g_odd), -0.5 * np.ones_like(np.asarray(x_odd)),
        rtol=1e-6, atol=1e-6,
    )

    # Multi-block + ragged-last-block coverage with a small byte budget
    # (same code paths the production 4 MiB budget uses, on small data).
    x2d = jax.random.normal(jax.random.PRNGKey(2), (200, 128), dtype=jnp.float32)
    y2d = jax.block_until_ready(_pallas_scale(x2d, -0.3, block_bytes=16 * 1024))
    np.testing.assert_allclose(np.asarray(y2d), np.asarray(x2d) * -0.3,
                               rtol=1e-6, atol=1e-6)

    x1d = jax.random.normal(jax.random.PRNGKey(3), (33, 257), dtype=jnp.float32)
    y1d = jax.block_until_ready(_pallas_scale(x1d, 0.7, block_bytes=4 * 1024))
    np.testing.assert_allclose(np.asarray(y1d), np.asarray(x1d) * 0.7,
                               rtol=1e-6, atol=1e-6)

    # bf16 grads hit the same byte-budgeted tiles (dtype-independent traffic).
    x_bf = jax.random.normal(jax.random.PRNGKey(4), (4, 256), dtype=jnp.bfloat16)
    y_bf = jax.block_until_ready(_pallas_scale(x_bf, -1.5))
    np.testing.assert_allclose(np.asarray(y_bf, dtype=np.float32),
                               np.asarray(x_bf, dtype=np.float32) * -1.5,
                               rtol=1e-2, atol=1e-2)

    print("KERNEL_OK")
</pallas_src>

<mosaic_0001>
module attributes {stable_mosaic.version = 11 : i64} {
  func.func @_scale_kernel(%arg0: i32, %arg1: memref<1xf32, #tpu.memory_space<smem>>, %arg2: memref<16x128xf32, #tpu.memory_space<vmem>>, %arg3: memref<16x128xf32, #tpu.memory_space<vmem>>) attributes {dimension_semantics = [#tpu.dimension_semantics<parallel>], iteration_bounds = array<i64: 1>, scalar_prefetch = 0 : i64, scratch_operands = 0 : i64, tpu.core_type = #tpu.core_type<tc>, window_params = [{transform_indices = @transform_0, window_bounds = array<i64: 1>}, {transform_indices = @transform_1, window_bounds = array<i64: 16, 128>}, {transform_indices = @transform_2, window_bounds = array<i64: 16, 128>}]} {
    %c0 = arith.constant 0 : index
    %c0_0 = arith.constant 0 : index
    %0 = vector.load %arg2[%c0, %c0_0] : memref<16x128xf32, #tpu.memory_space<vmem>>, vector<16x128xf32>
    %c0_1 = arith.constant 0 : index
    %1 = memref.load %arg1[%c0_1] : memref<1xf32, #tpu.memory_space<smem>>
    %2 = vector.broadcast %1 : f32 to vector<16x128xf32>
    %3 = arith.mulf %0, %2 : vector<16x128xf32>
    %c0_2 = arith.constant 0 : index
    %c0_3 = arith.constant 0 : index
    %4 = vector.load %arg3[%c0_2, %c0_3] : memref<16x128xf32, #tpu.memory_space<vmem>>, vector<16x128xf32>
    tpu.vector_store %arg3[%c0_2, %c0_3], %3 {strides = array<i32>} : memref<16x128xf32, #tpu.memory_space<vmem>>, vector<16x128xf32>,
    return
  }
  func.func @transform_0(%arg0: i32) -> i32 {
    %c0_i32 = arith.constant 0 : i32
    %c0_i32_0 = arith.constant 0 : i32
    return %c0_i32 : i32
  }
  func.func @transform_1(%arg0: i32) -> (i32, i32) {
    %c0_i32 = arith.constant 0 : i32
    %c0_i32_0 = arith.constant 0 : i32
    return %arg0, %c0_i32 : i32, i32
  }
  func.func @transform_2(%arg0: i32) -> (i32, i32) {
    %c0_i32 = arith.constant 0 : i32
    %c0_i32_0 = arith.constant 0 : i32
    return %arg0, %c0_i32 : i32, i32
  }
}

</mosaic_0001>

<bundles_post_ra>
// kernel: tpu_custom_call.1
= control target key start
LH: loop header
LB: loop body
LE: loop exit
PB: predicated region body
PF: predicated region fallthrough
CT: control target
= control target key end

     0   :  { %8 = vsyncpa [#allocation4], 0  ;;  %s128_s0 = inlined_call_operand.<no memory space> [shape: f32[1], index: 0, kind: input, shape index: {}]   ;;  %s129_s1 = inlined_call_operand.hbm [shape: f32[16,128], index: 1, kind: input, shape index: {}, may-alias: {1,2}]   ;;  %s130_s2 = inlined_call_operand.hbm [shape: f32[16,128], index: 2, kind: output, shape index: {}, may-alias: {1,2}]  }
   0x1   :  { %9 = vsyncpa [#allocation5], 0  ;;  %s100_s9 = smov [#allocation3]  }
   0x2   :  { %s17_s10 = sshll.u32 %s100_s9, 4  ;;  %s18_s10 = int_to_ptr.vmem [resolvable:$true] %s17_s10 }
   0x3   :  { %s64_s11 = scalar_lea.vmem %s18_s10, 256  ;;  %p69_p1 = scmp.lt.s32.totalorder %s18_s10, %s18_s10 }
   0x4   :  { %p65_p0 = scmp.ne.s32.totalorder %s18_s10, %s64_s11  ;;  %p70_p2 = scmp.lt.s32.totalorder %s64_s11, %s64_s11 }
   0x6   :  { %p71_p3 = por %p70_p2, %p69_p1 }
   0x8   :  { %p72_p4 = pnand %p71_p3, %p65_p0 }
   0xa   :  { %75 = shalt.err (!%p72_p4)
}
   0xb   :  { %s101_s12 = smov 128   ;;  %s102_s13 = smov 8  }
   0xc   :  { %23 = dma.hbm_to_vmem [thread:$0]  %s129_s1, 256, %s18_s10, [#allocation4], %s101_s12, %s101_s12, %s102_s13  }
   0xd   :  { %96 = dma.done.wait [#allocation4], 256  }
   0xe   :  { %97 = vsyncadd [#allocation4], 4294967040  ;;  %v30_v0 = vstv %s128_s0  ;;  %s103_s18 = smov [#allocation6]   ;;  %v27_v1 = vld [vmem:[#allocation3] sm:$0xff]  ;;  %v28_v2 = vld [vmem:[#allocation3 + $0x8] sm:$0xff] }
   0xf   :  { %s40_s19 = sshll.u32 %s103_s18, 4  ;;  %v31_v3 = vmul.f32 %v30_v0, %v27_v1  ;;  %v32_v4 = vmul.f32 %v30_v0, %v28_v2  ;;  %s41_s19 = int_to_ptr.vmem [resolvable:$true] %s40_s19 }
  0x10   :  { %s76_s20 = scalar_lea.vmem %s41_s19, 256  ;;  %p81_p6 = scmp.lt.s32.totalorder %s41_s19, %s41_s19 }
  0x11   :  { %33 = vst [vmem:[#allocation6] sm:$0xff] %v31_v3  ;;  %34 = vst [vmem:[#allocation6 + $0x8] sm:$0xff] %v32_v4  ;;  %p77_p5 = scmp.ne.s32.totalorder %s41_s19, %s76_s20  ;;  %p82_p7 = scmp.lt.s32.totalorder %s76_s20, %s76_s20 }
  0x13   :  { %p83_p8 = por %p82_p7, %p81_p6 }
  0x15   :  { %p84_p9 = pnand %p83_p8, %p77_p5 }
  0x17   :  { %87 = shalt.err (!%p84_p9)
}
  0x18   :  { %46 = dma.vmem_to_hbm [thread:$0]  %s41_s19, 256, %s130_s2, [#allocation5], %s101_s12, %s101_s12, %s102_s13  }
  0x19   :  { %98 = dma.done.wait [#allocation5], 256  }
  0x1a   :  { %99 = vsyncadd [#allocation5], 4294967040 }
  0x1b   :  { %50 = vsyncpa [#allocation4], 1 }
  0x1c   :  { %51 = vsyncpa [#allocation5], 1 }

</bundles_post_ra>
